<compile_context>
chip_gen: v6e
topology: v6e:2x2x1
jax: 0.10.0
libtpu: 0.0.40
codegen_flags: <defaults>
</compile_context>

<pallas_src>
import functools

import jax
import jax.numpy as jnp
from jax import lax
from jax.experimental import pallas as pl
from jax.experimental.pallas import tpu as pltpu


def _fnn_kernel(x_ref,
                w1t_ref, b1_ref,
                w2t_ref, b2_ref,
                w3t_ref, b3_ref,
                w4c_ref, b4_ref,
                o_ref):
    # x_ref:   (bb, in)   f32   untransposed input tile (contiguous DMA)
    # wNt_ref: (out, in)  f32   transposed weights (tiny, grid-resident)
    # bN_ref:  (out, 1)   f32   bias columns
    # w4c_ref: (32, 1)    f32   final-layer weight column
    # o_ref:   (1, bb)    f32   sigmoid output, lane-dense

    # Layer 1: contract the feature dim of both operands -> (128, bb) with the
    # batch on the lane axis.  (Dropout == identity in eval mode.)
    h = lax.dot_general(w1t_ref[...], x_ref[...],
                        (((1,), (1,)), ((), ())),
                        preferred_element_type=jnp.float32)
    h = jnp.maximum(h + b1_ref[...], 0.0)                      # (128, bb)
    # TODO(synk): training-mode dropout (p=0.4) omitted; inference semantics.

    # Layer 2: Linear + ReLU
    h = jnp.dot(w2t_ref[...], h, preferred_element_type=jnp.float32)
    h = jnp.maximum(h + b2_ref[...], 0.0)                      # (64, bb)

    # Layer 3: Linear + ReLU
    h = jnp.dot(w3t_ref[...], h, preferred_element_type=jnp.float32)
    h = jnp.maximum(h + b3_ref[...], 0.0)                      # (32, bb)

    # Layer 4: (32 -> 1) as VPU multiply + sublane reduction (skips an N=1 MXU
    # pass), then sigmoid.  Result is already lane-dense: (1, bb).
    logits = jnp.sum(w4c_ref[...] * h, axis=0, keepdims=True) + b4_ref[...]
    o_ref[...] = jax.nn.sigmoid(logits).astype(o_ref.dtype)


def _round_up(n, m):
    return pl.cdiv(n, m) * m


@functools.partial(jax.jit, static_argnames=("block_b",))
def fnn_forward(x, params, block_b=2048):
    """Fused FNN forward pass.

    x: [B, input_size] float32
    params: dict of w1..w4 ([in, out]) and b1..b4 ([1, out]) float32 arrays.
    block_b: batch tile (lane axis), rounded to a multiple of 128.
    """
    B, in_dim = x.shape
    h1 = params["w1"].shape[1]
    h2 = params["w2"].shape[1]
    h3 = params["w3"].shape[1]

    # Lane-aligned batch tile.  Clamp so large batches always produce >= 2 grid
    # steps (v7x has 2 TensorCores; "parallel" only shards with >= 2 steps).
    Bp128 = _round_up(B, 128)
    bb = min(_round_up(block_b, 128), _round_up(pl.cdiv(Bp128, 2), 128))
    bb = max(bb, 128)
    Bp = _round_up(B, bb)
    grid = (Bp // bb,)

    # Zero-pad the batch tail only when needed; no transpose, no dtype cast.
    if Bp != B:
        x = jnp.pad(x, ((0, Bp - B), (0, 0)))

    # Transposed weights (out, in); bias columns (out, 1).  All tiny.
    w1t = params["w1"].T.astype(jnp.float32)               # (128, in)
    w2t = params["w2"].T.astype(jnp.float32)               # (64, 128)
    w3t = params["w3"].T.astype(jnp.float32)               # (32, 64)
    w4c = params["w4"].astype(jnp.float32)                 # (32, 1) column
    b1c = params["b1"].T.astype(jnp.float32)               # (128, 1)
    b2c = params["b2"].T.astype(jnp.float32)               # (64, 1)
    b3c = params["b3"].T.astype(jnp.float32)               # (32, 1)
    b4c = params["b4"].astype(jnp.float32)                 # (1, 1)

    def full_spec(arr):
        # Constant index_map: block never changes, so Pallas skips re-copies.
        return pl.BlockSpec(arr.shape, lambda i: (0, 0))

    in_specs = [
        pl.BlockSpec((bb, in_dim), lambda i: (i, 0)),       # contiguous x tile
        full_spec(w1t), full_spec(b1c),
        full_spec(w2t), full_spec(b2c),
        full_spec(w3t), full_spec(b3c),
        full_spec(w4c), full_spec(b4c),
    ]
    out_spec = pl.BlockSpec((1, bb), lambda i: (0, i))

    weight_bytes = 4 * (w1t.size + w2t.size + w3t.size + w4c.size
                        + b1c.size + b2c.size + b3c.size + b4c.size)
    cost = pl.CostEstimate(
        flops=2 * Bp * (in_dim * h1 + h1 * h2 + h2 * h3 + h3),
        transcendentals=Bp,                                  # sigmoid exp
        bytes_accessed=4 * Bp * (in_dim + 1) + weight_bytes,
    )

    out_t = pl.pallas_call(
        _fnn_kernel,
        out_shape=jax.ShapeDtypeStruct((1, Bp), jnp.float32),
        grid_spec=pltpu.PrefetchScalarGridSpec(
            num_scalar_prefetch=0,
            grid=grid,
            in_specs=in_specs,
            out_specs=out_spec,
        ),
        compiler_params=pltpu.CompilerParams(
            dimension_semantics=("parallel",)),
        cost_estimate=cost,
    )(x, w1t, b1c, w2t, b2c, w3t, b3c, w4c, b4c)

    # Back to the PyTorch layout: (B, 1), dropping the batch padding.
    return out_t[0, :B].reshape(B, 1)


def init_params(key, input_size, hidden_sizes=(128, 64, 32)):
    """Deterministic PyTorch-style (uniform +/- 1/sqrt(fan_in)) init."""
    sizes = [input_size] + list(hidden_sizes) + [1]
    params = {}
    for idx, (fan_in, fan_out) in enumerate(zip(sizes[:-1], sizes[1:]), start=1):
        key, kw, kb = jax.random.split(key, 3)
        bound = 1.0 / jnp.sqrt(fan_in)
        params[f"w{idx}"] = jax.random.uniform(
            kw, (fan_in, fan_out), jnp.float32, -bound, bound)
        params[f"b{idx}"] = jax.random.uniform(
            kb, (1, fan_out), jnp.float32, -bound, bound)
    return params


def fnn_reference(x, params):
    """Pure-f32 reference (matches the PyTorch module in eval mode)."""
    h = jnp.maximum(x @ params["w1"] + params["b1"], 0.0)
    h = jnp.maximum(h @ params["w2"] + params["b2"], 0.0)
    h = jnp.maximum(h @ params["w3"] + params["b3"], 0.0)
    return jax.nn.sigmoid(h @ params["w4"] + params["b4"])


if __name__ == "__main__":
    key = jax.random.PRNGKey(0)
    k_params, k_x, k_x2 = jax.random.split(key, 3)

    batch = 8
    input_size = 32
    params = init_params(k_params, input_size)
    x = jax.random.normal(k_x, (batch, input_size), jnp.float32)

    out = fnn_forward(x, params)
    jax.block_until_ready(out)
    assert out.shape == (batch, 1)
    assert jnp.allclose(out, fnn_reference(x, params), atol=1e-5, rtol=1e-5)

    # Second case: batch not divisible by the tile -> padded tail + multi-step
    # parallel grid (128-wide tiles, 3 grid steps).
    batch2 = 300
    x2 = jax.random.normal(k_x2, (batch2, input_size), jnp.float32)
    out2 = fnn_forward(x2, params, block_b=128)
    jax.block_until_ready(out2)
    assert out2.shape == (batch2, 1)
    assert jnp.allclose(out2, fnn_reference(x2, params), atol=1e-5, rtol=1e-5)

    print("KERNEL_OK")
</pallas_src>

<mosaic_0001>
module attributes {stable_mosaic.version = 11 : i64} {
  func.func @_fnn_kernel(%arg0: i32, %arg1: memref<128x32xf32, #tpu.memory_space<vmem>>, %arg2: memref<128x32xf32, #tpu.memory_space<vmem>>, %arg3: memref<128x1xf32, #tpu.memory_space<vmem>>, %arg4: memref<64x128xf32, #tpu.memory_space<vmem>>, %arg5: memref<64x1xf32, #tpu.memory_space<vmem>>, %arg6: memref<32x64xf32, #tpu.memory_space<vmem>>, %arg7: memref<32x1xf32, #tpu.memory_space<vmem>>, %arg8: memref<32x1xf32, #tpu.memory_space<vmem>>, %arg9: memref<1x1xf32, #tpu.memory_space<vmem>>, %arg10: memref<1x128xf32, #tpu.memory_space<vmem>>) attributes {dimension_semantics = [#tpu.dimension_semantics<parallel>], iteration_bounds = array<i64: 1>, scalar_prefetch = 0 : i64, scratch_operands = 0 : i64, tpu.core_type = #tpu.core_type<tc>, window_params = [{transform_indices = @transform_0, window_bounds = array<i64: 128, 32>}, {pipeline_mode = #tpu.pipeline_mode<synchronous>, transform_indices = @transform_1, window_bounds = array<i64: 128, 32>}, {pipeline_mode = #tpu.pipeline_mode<synchronous>, transform_indices = @transform_2, window_bounds = array<i64: 128, 1>}, {pipeline_mode = #tpu.pipeline_mode<synchronous>, transform_indices = @transform_3, window_bounds = array<i64: 64, 128>}, {pipeline_mode = #tpu.pipeline_mode<synchronous>, transform_indices = @transform_4, window_bounds = array<i64: 64, 1>}, {pipeline_mode = #tpu.pipeline_mode<synchronous>, transform_indices = @transform_5, window_bounds = array<i64: 32, 64>}, {pipeline_mode = #tpu.pipeline_mode<synchronous>, transform_indices = @transform_6, window_bounds = array<i64: 32, 1>}, {pipeline_mode = #tpu.pipeline_mode<synchronous>, transform_indices = @transform_7, window_bounds = array<i64: 32, 1>}, {pipeline_mode = #tpu.pipeline_mode<synchronous>, transform_indices = @transform_8, window_bounds = array<i64: 1, 1>}, {transform_indices = @transform_9, window_bounds = array<i64: 1, 128>}]} {
    %c0 = arith.constant 0 : index
    %c0_0 = arith.constant 0 : index
    %0 = vector.load %arg2[%c0, %c0_0] : memref<128x32xf32, #tpu.memory_space<vmem>>, vector<128x32xf32>
    %c0_1 = arith.constant 0 : index
    %c0_2 = arith.constant 0 : index
    %1 = vector.load %arg1[%c0_1, %c0_2] : memref<128x32xf32, #tpu.memory_space<vmem>>, vector<128x32xf32>
    %cst = arith.constant dense<0.000000e+00> : vector<128x128xf32>
    %2 = tpu.matmul %0, %1, %cst {dimension_numbers = #tpu.dot_dimension_numbers<[1], [1], [0], [0], [0, 0, 1, 0], [], []>} : vector<128x32xf32>, vector<128x32xf32>, vector<128x128xf32> -> vector<128x128xf32>
    %c0_3 = arith.constant 0 : index
    %c0_4 = arith.constant 0 : index
    %3 = vector.load %arg3[%c0_3, %c0_4] : memref<128x1xf32, #tpu.memory_space<vmem>>, vector<128x1xf32>
    %4 = vector.broadcast %3 : vector<128x1xf32> to vector<128x128xf32>
    %5 = arith.addf %2, %4 : vector<128x128xf32>
    %cst_5 = arith.constant 0.000000e+00 : f32
    %6 = vector.broadcast %cst_5 : f32 to vector<128x128xf32>
    %7 = arith.maximumf %5, %6 : vector<128x128xf32>
    %c0_6 = arith.constant 0 : index
    %c0_7 = arith.constant 0 : index
    %8 = vector.load %arg4[%c0_6, %c0_7] : memref<64x128xf32, #tpu.memory_space<vmem>>, vector<64x128xf32>
    %cst_8 = arith.constant dense<0.000000e+00> : vector<64x128xf32>
    %9 = tpu.matmul %8, %7, %cst_8 {dimension_numbers = #tpu.dot_dimension_numbers<[1], [0], [0], [1], [0, 0, 1, 1], [], []>} : vector<64x128xf32>, vector<128x128xf32>, vector<64x128xf32> -> vector<64x128xf32>
    %c0_9 = arith.constant 0 : index
    %c0_10 = arith.constant 0 : index
    %10 = vector.load %arg5[%c0_9, %c0_10] : memref<64x1xf32, #tpu.memory_space<vmem>>, vector<64x1xf32>
    %11 = vector.broadcast %10 : vector<64x1xf32> to vector<64x128xf32>
    %12 = arith.addf %9, %11 : vector<64x128xf32>
    %cst_11 = arith.constant 0.000000e+00 : f32
    %13 = vector.broadcast %cst_11 : f32 to vector<64x128xf32>
    %14 = arith.maximumf %12, %13 : vector<64x128xf32>
    %c0_12 = arith.constant 0 : index
    %c0_13 = arith.constant 0 : index
    %15 = vector.load %arg6[%c0_12, %c0_13] : memref<32x64xf32, #tpu.memory_space<vmem>>, vector<32x64xf32>
    %cst_14 = arith.constant dense<0.000000e+00> : vector<32x128xf32>
    %16 = tpu.matmul %15, %14, %cst_14 {dimension_numbers = #tpu.dot_dimension_numbers<[1], [0], [0], [1], [0, 0, 1, 1], [], []>} : vector<32x64xf32>, vector<64x128xf32>, vector<32x128xf32> -> vector<32x128xf32>
    %c0_15 = arith.constant 0 : index
    %c0_16 = arith.constant 0 : index
    %17 = vector.load %arg7[%c0_15, %c0_16] : memref<32x1xf32, #tpu.memory_space<vmem>>, vector<32x1xf32>
    %18 = vector.broadcast %17 : vector<32x1xf32> to vector<32x128xf32>
    %19 = arith.addf %16, %18 : vector<32x128xf32>
    %cst_17 = arith.constant 0.000000e+00 : f32
    %20 = vector.broadcast %cst_17 : f32 to vector<32x128xf32>
    %21 = arith.maximumf %19, %20 : vector<32x128xf32>
    %c0_18 = arith.constant 0 : index
    %c0_19 = arith.constant 0 : index
    %22 = vector.load %arg8[%c0_18, %c0_19] : memref<32x1xf32, #tpu.memory_space<vmem>>, vector<32x1xf32>
    %23 = vector.broadcast %22 : vector<32x1xf32> to vector<32x128xf32>
    %24 = arith.mulf %23, %21 : vector<32x128xf32>
    %cst_20 = arith.constant dense<0.000000e+00> : vector<128xf32>
    %25 = vector.multi_reduction <add>, %24, %cst_20 [0] : vector<32x128xf32> to vector<128xf32>
    %26 = vector.shape_cast %25 : vector<128xf32> to vector<1x128xf32>
    %c0_21 = arith.constant 0 : index
    %c0_22 = arith.constant 0 : index
    %27 = vector.load %arg9[%c0_21, %c0_22] : memref<1x1xf32, #tpu.memory_space<vmem>>, vector<1x1xf32>
    %28 = vector.broadcast %27 : vector<1x1xf32> to vector<1x128xf32>
    %29 = arith.addf %26, %28 : vector<1x128xf32>
    %30 = arith.negf %29 : vector<1x128xf32>
    %31 = math.exp %30 : vector<1x128xf32>
    %cst_23 = arith.constant 1.000000e+00 : f32
    %32 = vector.broadcast %cst_23 : f32 to vector<1x128xf32>
    %33 = arith.addf %32, %31 : vector<1x128xf32>
    %34 = arith.divf %32, %33 : vector<1x128xf32>
    %c0_24 = arith.constant 0 : index
    %c0_25 = arith.constant 0 : index
    %35 = vector.load %arg10[%c0_24, %c0_25] : memref<1x128xf32, #tpu.memory_space<vmem>>, vector<1x128xf32>
    tpu.vector_store %arg10[%c0_24, %c0_25], %34 {strides = array<i32>} : memref<1x128xf32, #tpu.memory_space<vmem>>, vector<1x128xf32>,
    return
  }
  func.func @transform_0(%arg0: i32) -> (i32, i32) {
    %c0_i32 = arith.constant 0 : i32
    %c0_i32_0 = arith.constant 0 : i32
    return %arg0, %c0_i32 : i32, i32
  }
  func.func @transform_1(%arg0: i32) -> (i32, i32) {
    %c0_i32 = arith.constant 0 : i32
    %c0_i32_0 = arith.constant 0 : i32
    %c0_i32_1 = arith.constant 0 : i32
    return %c0_i32, %c0_i32_0 : i32, i32
  }
  func.func @transform_2(%arg0: i32) -> (i32, i32) {
    %c0_i32 = arith.constant 0 : i32
    %c0_i32_0 = arith.constant 0 : i32
    %c0_i32_1 = arith.constant 0 : i32
    return %c0_i32, %c0_i32_0 : i32, i32
  }
  func.func @transform_3(%arg0: i32) -> (i32, i32) {
    %c0_i32 = arith.constant 0 : i32
    %c0_i32_0 = arith.constant 0 : i32
    %c0_i32_1 = arith.constant 0 : i32
    return %c0_i32, %c0_i32_0 : i32, i32
  }
  func.func @transform_4(%arg0: i32) -> (i32, i32) {
    %c0_i32 = arith.constant 0 : i32
    %c0_i32_0 = arith.constant 0 : i32
    %c0_i32_1 = arith.constant 0 : i32
    return %c0_i32, %c0_i32_0 : i32, i32
  }
  func.func @transform_5(%arg0: i32) -> (i32, i32) {
    %c0_i32 = arith.constant 0 : i32
    %c0_i32_0 = arith.constant 0 : i32
    %c0_i32_1 = arith.constant 0 : i32
    return %c0_i32, %c0_i32_0 : i32, i32
  }
  func.func @transform_6(%arg0: i32) -> (i32, i32) {
    %c0_i32 = arith.constant 0 : i32
    %c0_i32_0 = arith.constant 0 : i32
    %c0_i32_1 = arith.constant 0 : i32
    return %c0_i32, %c0_i32_0 : i32, i32
  }
  func.func @transform_7(%arg0: i32) -> (i32, i32) {
    %c0_i32 = arith.constant 0 : i32
    %c0_i32_0 = arith.constant 0 : i32
    %c0_i32_1 = arith.constant 0 : i32
    return %c0_i32, %c0_i32_0 : i32, i32
  }
  func.func @transform_8(%arg0: i32) -> (i32, i32) {
    %c0_i32 = arith.constant 0 : i32
    %c0_i32_0 = arith.constant 0 : i32
    %c0_i32_1 = arith.constant 0 : i32
    return %c0_i32, %c0_i32_0 : i32, i32
  }
  func.func @transform_9(%arg0: i32) -> (i32, i32) {
    %c0_i32 = arith.constant 0 : i32
    %c0_i32_0 = arith.constant 0 : i32
    return %c0_i32, %arg0 : i32, i32
  }
}

</mosaic_0001>

<bundles_post_ra>
// kernel: fnn_forward.1
= control target key start
LH: loop header
LB: loop body
LE: loop exit
PB: predicated region body
PF: predicated region fallthrough
CT: control target
= control target key end

     0   :  { %vm162_vm0 = vcmask 261120   ;;  %v1012_v2 = vmov 0   ;;  %vm617_vm1 = vcmask 523264   ;;  %s1361_s0 = inlined_call_operand.vmem [shape: f32[128,32], index: 0, kind: input, shape index: {}]   ;;  %s1362_s8 = inlined_call_operand.<no memory space> [shape: f32[1,1], index: 8, kind: input, shape index: {}]   ;;  %s1363_s1 = inlined_call_operand.vmem [shape: f32[128,32], index: 1, kind: input, shape index: {}]   ;;  %s1364_s2 = inlined_call_operand.vmem [shape: f32[128,1], index: 2, kind: input, shape index: {}]   ;;  %s1365_s4 = inlined_call_operand.vmem [shape: f32[64,1], index: 4, kind: input, shape index: {}]   ;;  %s1366_s6 = inlined_call_operand.vmem [shape: f32[32,1], index: 6, kind: input, shape index: {}]   ;;  %s1367_s7 = inlined_call_operand.vmem [shape: f32[32,1], index: 7, kind: input, shape index: {}]   ;;  %s1368_s3 = inlined_call_operand.vmem [shape: f32[64,128], index: 3, kind: input, shape index: {}]   ;;  %s1369_s5 = inlined_call_operand.vmem [shape: f32[32,64], index: 5, kind: input, shape index: {}]   ;;  %s1370_s9 = inlined_call_operand.vmem [shape: f32[1,128], index: 9, kind: output, shape index: {}]  }
   0x1   :  { %v65_v0 = vld [vmem:[%s1361_s0 + $0x78] sm:$0xff]  ;;  %v64_v1 = vld [vmem:[%s1361_s0 + $0x70] sm:$0xff]  ;;  %1006 = vset.pattern.permute.xlu0 %v1012_v2  ;;  %1007 = vset.pattern.permute.xlu1 %v1012_v2  ;;  %v14_v3 = vstv %s1362_s8  ;;  %v63_v4 = vld [vmem:[%s1361_s0 + $0x68] sm:$0xff] }
   0x2   :  { %883 = vmatprep.subr.msk.mxu0 %vm162_vm0, %v65_v0  ;;  %15 = vst [vmem:[#allocation2] sm:$0x1] %v14_v3  ;;  %v34_v5 = vld [vmem:[%s1363_s1] sm:$0xff]  ;;  %v81_v7 = vld [vmem:[%s1364_s2 + $0x78] sm:$0xff]  ;;  %v79_v8 = vld [vmem:[%s1364_s2 + $0x68] sm:$0xff] }
   0x3   :  { %884 = vmatpush3.xpose.msk.msra.mxu0 %vm162_vm0, %v65_v0  ;;  %915 = vmatprep.mubr.msk.f32.mxu0 %vm162_vm0, %v34_v5  ;;  %v62_v6 = vld [vmem:[%s1361_s0 + $0x60] sm:$0xff]  ;;  %v61_v9 = vld [vmem:[%s1361_s0 + $0x58] sm:$0xff]  ;;  %v80_v10 = vld [vmem:[%s1364_s2 + $0x70] sm:$0xff] }
   0x4   :  { %885 = vmatprep.subr.msk.mxu0 %vm162_vm0, %v64_v1  ;;  %159 = vperm.xlu0 %1006, %v81_v7   ;;  %v78_v11 = vld [vmem:[%s1364_s2 + $0x60] sm:$0xff]  ;;  %v60_v12 = vld [vmem:[%s1361_s0 + $0x50] sm:$0xff]  ;;  %v77_v13 = vld [vmem:[%s1364_s2 + $0x58] sm:$0xff] }
   0x5   :  { %149 = vperm.xlu1 %1007, %v79_v8   ;;  %v76_v14 = vld [vmem:[%s1364_s2 + $0x50] sm:$0xff]  ;;  %v59_v15 = vld [vmem:[%s1361_s0 + $0x48] sm:$0xff]  ;;  %v74_v17 = vld [vmem:[%s1364_s2 + $0x40] sm:$0xff] }
   0x6   :  { %v75_v16 = vld [vmem:[%s1364_s2 + $0x48] sm:$0xff]  ;;  %v58_v18 = vld [vmem:[%s1361_s0 + $0x40] sm:$0xff]  ;;  %v73_v19 = vld [vmem:[%s1364_s2 + $0x38] sm:$0xff] }
   0x7   :  { %886 = vmatpush3.xpose.msk.msra.mxu0 %vm162_vm0, %v64_v1  ;;  %v72_v20 = vld [vmem:[%s1364_s2 + $0x30] sm:$0xff]  ;;  %v57_v21 = vld [vmem:[%s1361_s0 + $0x38] sm:$0xff]  ;;  %v71_v22 = vld [vmem:[%s1364_s2 + $0x28] sm:$0xff] }
   0x8   :  { %887 = vmatprep.subr.msk.mxu0 %vm162_vm0, %v63_v4  ;;  %154 = vperm.xlu0 %1006, %v80_v10   ;;  %v70_v23 = vld [vmem:[%s1364_s2 + $0x20] sm:$0xff]  ;;  %v56_v24 = vld [vmem:[%s1361_s0 + $0x30] sm:$0xff]  ;;  %v69_v25 = vld [vmem:[%s1364_s2 + $0x18] sm:$0xff] }
   0x9   :  { %144 = vperm.xlu1 %1007, %v78_v11   ;;  %v68_v26 = vld [vmem:[%s1364_s2 + $0x10] sm:$0xff]  ;;  %v55_v27 = vld [vmem:[%s1361_s0 + $0x28] sm:$0xff]  ;;  %v66_v29 = vld [vmem:[%s1364_s2] sm:$0xff] }
   0xa   :  { %v67_v28 = vld [vmem:[%s1364_s2 + $0x8] sm:$0xff]  ;;  %v54_v30 = vld [vmem:[%s1361_s0 + $0x20] sm:$0xff]  ;;  %v435_v31 = vld [vmem:[%s1365_s4 + $0x38] sm:$0xff] }
   0xb   :  { %888 = vmatpush3.xpose.msk.msra.mxu0 %vm162_vm0, %v63_v4  ;;  %v434_v32 = vld [vmem:[%s1365_s4 + $0x30] sm:$0xff]  ;;  %v53_v33 = vld [vmem:[%s1361_s0 + $0x18] sm:$0xff]  ;;  %v433_v34 = vld [vmem:[%s1365_s4 + $0x28] sm:$0xff] }
   0xc   :  { %889 = vmatprep.subr.msk.mxu0 %vm162_vm0, %v62_v6  ;;  %139 = vperm.xlu0 %1006, %v77_v13   ;;  %v432_v35 = vld [vmem:[%s1365_s4 + $0x20] sm:$0xff]  ;;  %v52_v36 = vld [vmem:[%s1361_s0 + $0x10] sm:$0xff]  ;;  %v431_v37 = vld [vmem:[%s1365_s4 + $0x18] sm:$0xff] }
   0xd   :  { %134 = vperm.xlu1 %1007, %v76_v14   ;;  %v430_v38 = vld [vmem:[%s1365_s4 + $0x10] sm:$0xff]  ;;  %v51_v39 = vld [vmem:[%s1361_s0 + $0x8] sm:$0xff]  ;;  %v428_v41 = vld [vmem:[%s1365_s4] sm:$0xff] }
   0xe   :  { %v429_v40 = vld [vmem:[%s1365_s4 + $0x8] sm:$0xff]  ;;  %v50_v42 = vld [vmem:[%s1361_s0] sm:$0xff]  ;;  %v595_v45 = vld [vmem:[%s1366_s6 + $0x10] sm:$0xff] }
   0xf   :  { %890 = vmatpush3.xpose.msk.msra.mxu0 %vm162_vm0, %v62_v6  ;;  %v593_v43 = vld [vmem:[%s1366_s6] sm:$0xff]  ;;  %v594_v44 = vld [vmem:[%s1366_s6 + $0x8] sm:$0xff]  ;;  %v596_v46 = vld [vmem:[%s1366_s6 + $0x18] sm:$0xff] }
  0x10   :  { %891 = vmatprep.subr.msk.mxu0 %vm162_vm0, %v61_v9  ;;  %129 = vperm.xlu0 %1006, %v75_v16   ;;  %v35_v47 = vld [vmem:[%s1363_s1 + $0x8] sm:$0xff]  ;;  %v36_v48 = vld [vmem:[%s1363_s1 + $0x10] sm:$0xff]  ;;  %v719_v49 = vld [vmem:[%s1367_s7] sm:$0xff] }
  0x11   :  { %124 = vperm.xlu1 %1007, %v74_v17   ;;  %v720_v50 = vld [vmem:[%s1367_s7 + $0x8] sm:$0xff]  ;;  %v37_v51 = vld [vmem:[%s1363_s1 + $0x18] sm:$0xff]  ;;  %v38_v52 = vld [vmem:[%s1363_s1 + $0x20] sm:$0xff] }
  0x12   :  { %v721_v53 = vld [vmem:[%s1367_s7 + $0x10] sm:$0xff]  ;;  %v722_v54 = vld [vmem:[%s1367_s7 + $0x18] sm:$0xff]  ;;  %v39_v55 = vld [vmem:[%s1363_s1 + $0x28] sm:$0xff] }
  0x13   :  { %892 = vmatpush3.xpose.msk.msra.mxu0 %vm162_vm0, %v61_v9  ;;  %v40_v56 = vld [vmem:[%s1363_s1 + $0x30] sm:$0xff]  ;;  %v756_v57 = vld [vmem:[#allocation2] sm:$0x1]  ;;  %v41_v58 = vld [vmem:[%s1363_s1 + $0x38] sm:$0xff] }
  0x14   :  { %893 = vmatprep.subr.msk.mxu0 %vm162_vm0, %v60_v12  ;;  %119 = vperm.xlu0 %1006, %v73_v19   ;;  %v42_v59 = vld [vmem:[%s1363_s1 + $0x40] sm:$0xff]  ;;  %v43_v60 = vld [vmem:[%s1363_s1 + $0x48] sm:$0xff]  ;;  %v44_v61 = vld [vmem:[%s1363_s1 + $0x50] sm:$0xff] }
  0x15   :  { %114 = vperm.xlu1 %1007, %v72_v20   ;;  %v45_v62 = vld [vmem:[%s1363_s1 + $0x58] sm:$0xff]  ;;  %v46_v63 = vld [vmem:[%s1363_s1 + $0x60] sm:$0xff]  ;;  %v47_v0 = vld [vmem:[%s1363_s1 + $0x68] sm:$0xff] }
  0x16   :  { %v48_v1 = vld [vmem:[%s1363_s1 + $0x70] sm:$0xff]  ;;  %v49_v2 = vld [vmem:[%s1363_s1 + $0x78] sm:$0xff]  ;;  %v420_v3 = vld [vmem:[%s1368_s3] sm:$0xff] }
  0x17   :  { %894 = vmatpush3.xpose.msk.msra.mxu0 %vm162_vm0, %v60_v12  ;;  %971 = vmatprep.mubr.f32.mxu1 %v420_v3 }
  0x18   :  { %895 = vmatprep.subr.msk.mxu0 %vm162_vm0, %v59_v15  ;;  %109 = vperm.xlu0 %1006, %v71_v22  }
  0x19   :  { %104 = vperm.xlu1 %1007, %v70_v23  }
  0x1b   :  { %896 = vmatpush3.xpose.msk.msra.mxu0 %vm162_vm0, %v59_v15 }
  0x1c   :  { %897 = vmatprep.subr.msk.mxu0 %vm162_vm0, %v58_v18  ;;  %99 = vperm.xlu0 %1006, %v69_v25  }
  0x1d   :  { %94 = vperm.xlu1 %1007, %v68_v26  }
  0x1f   :  { %898 = vmatpush3.xpose.msk.msra.mxu0 %vm162_vm0, %v58_v18 }
  0x20   :  { %899 = vmatprep.subr.msk.mxu0 %vm162_vm0, %v57_v21  ;;  %89 = vperm.xlu0 %1006, %v67_v28  }
  0x21   :  { %84 = vperm.xlu1 %1007, %v66_v29  }
  0x23   :  { %900 = vmatpush3.xpose.msk.msra.mxu0 %vm162_vm0, %v57_v21 }
  0x24   :  { %901 = vmatprep.subr.msk.mxu0 %vm162_vm0, %v56_v24  ;;  %473 = vperm.xlu0 %1006, %v435_v31  }
  0x25   :  { %468 = vperm.xlu1 %1007, %v434_v32  }
  0x27   :  { %902 = vmatpush3.xpose.msk.msra.mxu0 %vm162_vm0, %v56_v24 }
  0x28   :  { %903 = vmatprep.subr.msk.mxu0 %vm162_vm0, %v55_v27  ;;  %463 = vperm.xlu0 %1006, %v433_v34  }
  0x29   :  { %458 = vperm.xlu1 %1007, %v432_v35  }
  0x2b   :  { %904 = vmatpush3.xpose.msk.msra.mxu0 %vm162_vm0, %v55_v27 }
  0x2c   :  { %905 = vmatprep.subr.msk.mxu0 %vm162_vm0, %v54_v30  ;;  %453 = vperm.xlu0 %1006, %v431_v37  }
  0x2d   :  { %448 = vperm.xlu1 %1007, %v430_v38  }
  0x2f   :  { %906 = vmatpush3.xpose.msk.msra.mxu0 %vm162_vm0, %v54_v30 }
  0x30   :  { %907 = vmatprep.subr.msk.mxu0 %vm162_vm0, %v53_v33  ;;  %443 = vperm.xlu0 %1006, %v429_v40  }
  0x31   :  { %438 = vperm.xlu1 %1007, %v428_v41  }
  0x33   :  { %908 = vmatpush3.xpose.msk.msra.mxu0 %vm162_vm0, %v53_v33 }
  0x34   :  { %909 = vmatprep.subr.msk.mxu0 %vm162_vm0, %v52_v36  ;;  %599 = vperm.xlu0 %1006, %v593_v43  }
  0x35   :  { %604 = vperm.xlu1 %1007, %v594_v44  }
  0x37   :  { %910 = vmatpush3.xpose.msk.msra.mxu0 %vm162_vm0, %v52_v36 }
  0x38   :  { %911 = vmatprep.subr.msk.mxu0 %vm162_vm0, %v51_v39  ;;  %609 = vperm.xlu0 %1006, %v595_v45  }
  0x39   :  { %614 = vperm.xlu1 %1007, %v596_v46  }
  0x3b   :  { %912 = vmatpush3.xpose.msk.msra.mxu0 %vm162_vm0, %v51_v39 }
  0x3c   :  { %913 = vmatprep.subr.msk.mxu0 %vm162_vm0, %v50_v42  ;;  %725 = vperm.xlu0 %1006, %v719_v49  }
  0x3d   :  { %730 = vperm.xlu1 %1007, %v720_v50  }
  0x3f   :  { %914 = vmatpush3.xpose.msk.msra.mxu0 %vm162_vm0, %v50_v42 }
  0x40   :  { %735 = vperm.xlu0 %1006, %v721_v53  }
  0x41   :  { %740 = vperm.xlu1 %1007, %v722_v54  }
  0x42   :  { %916 = vmatmul.mubr.msk.f32.vlgmr.msra.gmra.mxu0 %vm162_vm0, %v35_v47 }
  0x43   :  { %918 = vmatprep.mubr.msk.f32.mxu0 %vm162_vm0, %v36_v48 }
  0x44   :  { %759 = vperm.xlu0 %1006, %v756_v57  }
  0x46   :  { %919 = vmatmul.mubr.msk.f32.gmra.mxu0 %vm162_vm0, %v37_v51 }
  0x47   :  { %921 = vmatprep.mubr.msk.f32.mxu0 %vm162_vm0, %v38_v52 }
  0x4a   :  { %922 = vmatmul.mubr.msk.f32.gmra.mxu0 %vm162_vm0, %v39_v55 }
  0x4b   :  { %924 = vmatprep.mubr.msk.f32.mxu0 %vm162_vm0, %v40_v56 }
  0x4e   :  { %925 = vmatmul.mubr.msk.f32.gmra.mxu0 %vm162_vm0, %v41_v58 }
  0x4f   :  { %927 = vmatprep.mubr.msk.f32.mxu0 %vm162_vm0, %v42_v59 }
  0x52   :  { %928 = vmatmul.mubr.msk.f32.gmra.mxu0 %vm162_vm0, %v43_v60 }
  0x53   :  { %930 = vmatprep.mubr.msk.f32.mxu0 %vm162_vm0, %v44_v61 }
  0x56   :  { %931 = vmatmul.mubr.msk.f32.gmra.mxu0 %vm162_vm0, %v45_v62 }
  0x57   :  { %933 = vmatprep.mubr.msk.f32.mxu0 %vm162_vm0, %v46_v63 }
  0x5a   :  { %934 = vmatmul.mubr.msk.f32.gmra.mxu0 %vm162_vm0, %v47_v0 }
  0x5b   :  { %936 = vmatprep.mubr.msk.f32.mxu0 %vm162_vm0, %v48_v1 }
  0x5e   :  { %937 = vmatmul.mubr.msk.f32.gmra.mxu0 %vm162_vm0, %v49_v2 }
  0x7f   :  { %v160_v10 = vpop.permute.xlu0 %159 }
  0x80   :  { %v150_v12 = vpop.permute.xlu1 %149 }
  0x83   :  { %v155_v15 = vpop.permute.xlu0 %154 }
  0x84   :  { %v145_v17 = vpop.permute.xlu1 %144 }
  0x87   :  { %v140_v20 = vpop.permute.xlu0 %139 }
  0x88   :  { %v135_v22 = vpop.permute.xlu1 %134 }
  0x8b   :  { %v130_v26 = vpop.permute.xlu0 %129 }
  0x8c   :  { %v125_v31 = vpop.permute.xlu1 %124 }
  0x8f   :  { %v120_v36 = vpop.permute.xlu0 %119 }
  0x90   :  { %v115_v39 = vpop.permute.xlu1 %114 }
  0x93   :  { %v110_v44 = vpop.permute.xlu0 %109 }
  0x94   :  { %v105_v47 = vpop.permute.xlu1 %104 }
  0x97   :  { %v100_v52 = vpop.permute.xlu0 %99 }
  0x98   :  { %v95_v55 = vpop.permute.xlu1 %94 }
  0x9b   :  { %v90_v60 = vpop.permute.xlu0 %89 }
  0x9c   :  { %v85_v63 = vpop.permute.xlu1 %84 }
 0x102   :  { %v1309_v4 = vpop.f32.mrf.mxu0 }
 0x103   :  { %v331_v61 = vadd.f32 %v1309_v4, %v90_v60  ;;  %v422_v4 = vld [vmem:[%s1368_s3 + $0x10] sm:$0xff] }
 0x104   :  { %v1311_v5 = vpop.f32.mrf.mxu0 }
 0x105   :  { %v326_v0 = vadd.f32 %v1311_v5, %v85_v63  ;;  %v405_v2 = vmax.f32 %v331_v61, 0.0  ;;  %v423_v5 = vld [vmem:[%s1368_s3 + $0x18] sm:$0xff] }
 0x106   :  { %v1313_v6 = vpop.f32.mrf.mxu0 }
 0x107   :  { %v341_v56 = vadd.f32 %v1313_v6, %v100_v52  ;;  %v404_v3 = vmax.f32 %v326_v0, 0.0  ;;  %v421_v6 = vld [vmem:[%s1368_s3 + $0x8] sm:$0xff] }
 0x108   :  { %v1315_v7 = vpop.f32.mrf.mxu0 }
 0x109   :  { %v336_v58 = vadd.f32 %v1315_v7, %v95_v55  ;;  %v407_v62 = vmax.f32 %v341_v56, 0.0  ;;  %v424_v7 = vld [vmem:[%s1368_s3 + $0x20] sm:$0xff] }
 0x10a   :  { %v923_v8 = vpop.f32.mrf.mxu0 }
 0x10b   :  { %v351_v50 = vadd.f32 %v923_v8, %v110_v44  ;;  %v406_v1 = vmax.f32 %v336_v58, 0.0  ;;  %v425_v8 = vld [vmem:[%s1368_s3 + $0x28] sm:$0xff] }
 0x10c   :  { %v345_v9 = vpop.f32.mrf.mxu0  ;;  %v590_v44 = vld [vmem:[%s1369_s5 + $0x8] sm:$0xff] }
 0x10d   :  { %v346_v53 = vadd.f32 %v345_v9, %v105_v47  ;;  %v409_v57 = vmax.f32 %v351_v50, 0.0  ;;  %v426_v9 = vld [vmem:[%s1368_s3 + $0x30] sm:$0xff] }
 0x10e   :  { %v926_v11 = vpop.f32.mrf.mxu0 }
 0x10f   :  { %v361_v45 = vadd.f32 %v926_v11, %v120_v36  ;;  %v408_v59 = vmax.f32 %v346_v53, 0.0  ;;  %v589_v11 = vld [vmem:[%s1369_s5] sm:$0xff] }
 0x110   :  { %v355_v13 = vpop.f32.mrf.mxu0 }
 0x111   :  { %v356_v48 = vadd.f32 %v355_v13, %v115_v39  ;;  %v411_v51 = vmax.f32 %v361_v45, 0.0  ;;  %v591_v45 = vld [vmem:[%s1369_s5 + $0x10] sm:$0xff] }
 0x112   :  { %v929_v14 = vpop.f32.mrf.mxu0 }
 0x113   :  { %v371_v40 = vadd.f32 %v929_v14, %v130_v26  ;;  %v410_v54 = vmax.f32 %v356_v48, 0.0  ;;  %v474_v14 = vpop.permute.xlu0 %473 }
 0x114   :  { %v365_v16 = vpop.f32.mrf.mxu0 }
 0x115   :  { %v366_v42 = vadd.f32 %v365_v16, %v125_v31  ;;  %v413_v46 = vmax.f32 %v371_v40, 0.0  ;;  %v469_v16 = vpop.permute.xlu1 %468 }
 0x116   :  { %v932_v18 = vpop.f32.mrf.mxu0 }
 0x117   :  { %v381_v34 = vadd.f32 %v932_v18, %v140_v20  ;;  %v412_v49 = vmax.f32 %v366_v42, 0.0 }
 0x118   :  { %v375_v19 = vpop.f32.mrf.mxu0 }
 0x119   :  { %v376_v37 = vadd.f32 %v375_v19, %v135_v22  ;;  %v415_v41 = vmax.f32 %v381_v34, 0.0  ;;  %v464_v19 = vpop.permute.xlu0 %463 }
 0x11a   :  { %v935_v21 = vpop.f32.mrf.mxu0 }
 0x11b   :  { %v391_v28 = vadd.f32 %v935_v21, %v150_v12  ;;  %v414_v43 = vmax.f32 %v376_v37, 0.0  ;;  %v459_v21 = vpop.permute.xlu1 %458 }
 0x11c   :  { %v385_v23 = vpop.f32.mrf.mxu0 }
 0x11d   :  { %v386_v32 = vadd.f32 %v385_v23, %v145_v17  ;;  %v417_v35 = vmax.f32 %v391_v28, 0.0  ;;  %v454_v28 = vpop.permute.xlu0 %453 }
 0x11e   :  { %v938_v24 = vpop.f32.mrf.mxu0 }
 0x11f   :  { %v401_v25 = vadd.f32 %v938_v24, %v160_v10  ;;  %v416_v38 = vmax.f32 %v386_v32, 0.0  ;;  %v427_v10 = vld [vmem:[%s1368_s3 + $0x38] sm:$0xff]  ;;  %v449_v31 = vpop.permute.xlu1 %448 }
 0x120   :  { %v395_v27 = vpop.f32.mrf.mxu0 }
 0x121   :  { %v419_v29 = vmax.f32 %v401_v25, 0.0  ;;  %v396_v30 = vadd.f32 %v395_v27, %v155_v15  ;;  %v444_v36 = vpop.permute.xlu0 %443 }
 0x123   :  { %v418_v33 = vmax.f32 %v396_v30, 0.0  ;;  %939 = vmatprep.subr.mxu1 %v419_v29  ;;  %v439_v39 = vpop.permute.xlu1 %438 }
 0x124   :  { %940 = vmatpush3.msra.mxu1 %v419_v29 }
 0x125   :  { %941 = vmatprep.subr.mxu1 %v418_v33  ;;  %v600_v47 = vpop.permute.xlu0 %599 }
 0x126   :  { %942 = vmatpush3.msra.mxu1 %v418_v33 }
 0x127   :  { %943 = vmatprep.subr.mxu1 %v417_v35  ;;  %v605_v48 = vpop.permute.xlu1 %604 }
 0x128   :  { %944 = vmatpush3.msra.mxu1 %v417_v35 }
 0x129   :  { %945 = vmatprep.subr.mxu1 %v416_v38 }
 0x12a   :  { %946 = vmatpush3.msra.mxu1 %v416_v38 }
 0x12b   :  { %947 = vmatprep.subr.mxu1 %v415_v41  ;;  %v615_v50 = vpop.permute.xlu1 %614 }
 0x12c   :  { %948 = vmatpush3.msra.mxu1 %v415_v41 }
 0x12d   :  { %949 = vmatprep.subr.mxu1 %v414_v43 }
 0x12e   :  { %950 = vmatpush3.msra.mxu1 %v414_v43 }
 0x12f   :  { %951 = vmatprep.subr.mxu1 %v413_v46  ;;  %v731_v60 = vpop.permute.xlu1 %730 }
 0x130   :  { %952 = vmatpush3.msra.mxu1 %v413_v46  ;;  %v592_v46 = vld [vmem:[%s1369_s5 + $0x18] sm:$0xff] }
 0x131   :  { %953 = vmatprep.subr.mxu1 %v412_v49 }
 0x132   :  { %954 = vmatpush3.msra.mxu1 %v412_v49  ;;  %v610_v49 = vpop.permute.xlu0 %609 }
 0x133   :  { %955 = vmatprep.subr.mxu1 %v411_v51 }
 0x134   :  { %956 = vmatpush3.msra.mxu1 %v411_v51 }
 0x135   :  { %957 = vmatprep.subr.mxu1 %v410_v54 }
 0x136   :  { %958 = vmatpush3.msra.mxu1 %v410_v54  ;;  %v726_v55 = vpop.permute.xlu0 %725 }
 0x137   :  { %959 = vmatprep.subr.mxu1 %v409_v57 }
 0x138   :  { %960 = vmatpush3.msra.mxu1 %v409_v57 }
 0x139   :  { %961 = vmatprep.subr.mxu1 %v408_v59 }
 0x13a   :  { %962 = vmatpush3.msra.mxu1 %v408_v59 }
 0x13b   :  { %963 = vmatprep.subr.mxu1 %v407_v62 }
 0x13c   :  { %964 = vmatpush3.msra.mxu1 %v407_v62 }
 0x13d   :  { %965 = vmatprep.subr.mxu1 %v406_v1 }
 0x13e   :  { %966 = vmatpush3.msra.mxu1 %v406_v1 }
 0x13f   :  { %967 = vmatprep.subr.mxu1 %v405_v2 }
 0x140   :  { %968 = vmatpush3.msra.mxu1 %v405_v2 }
 0x141   :  { %969 = vmatprep.subr.mxu1 %v404_v3 }
 0x142   :  { %970 = vmatpush3.msra.mxu1 %v404_v3  ;;  %v736_v3 = vpop.permute.xlu0 %735 }
 0x143   :  { %972 = vmatmul.mubr.f32.vlgmr.msra.gmra.mxu1 %v421_v6 }
 0x144   :  { %974 = vmatprep.mubr.f32.mxu1 %v422_v4 }
 0x147   :  { %975 = vmatmul.mubr.f32.gmra.mxu1 %v423_v5  ;;  %v741_v5 = vpop.permute.xlu1 %740 }
 0x148   :  { %977 = vmatprep.mubr.f32.mxu1 %v424_v7 }
 0x14b   :  { %978 = vmatmul.mubr.f32.gmra.mxu1 %v425_v8 }
 0x14c   :  { %980 = vmatprep.mubr.f32.mxu1 %v426_v9  ;;  %v762_v9 = vlaneseq }
 0x14f   :  { %981 = vmatmul.mubr.f32.gmra.mxu1 %v427_v10 }
 0x150   :  { %999 = vmatprep.mubr.msk.f32.mxu1 %vm617_vm1, %v589_v11 }
 0x203   :  { %v973_v12 = vpop.f32.mrf.mxu1 }
 0x204   :  { %v548_v37 = vadd.f32 %v973_v12, %v444_v36  ;;  %v763_v12 = vshrl.u32 %v762_v9, 7 }
 0x205   :  { %v542_v13 = vpop.f32.mrf.mxu1 }
 0x206   :  { %v543_v40 = vadd.f32 %v542_v13, %v439_v39  ;;  %v582_v42 = vmax.f32 %v548_v37, 0.0 }
 0x207   :  { %v976_v15 = vpop.f32.mrf.mxu1 }
 0x208   :  { %v558_v32 = vadd.f32 %v976_v15, %v454_v28  ;;  %v581_v43 = vmax.f32 %v543_v40, 0.0  ;;  %v764_v15 = vsub.s32 0, %v763_v12 }
 0x209   :  { %v552_v17 = vpop.f32.mrf.mxu1 }
 0x20a   :  { %v553_v34 = vadd.f32 %v552_v17, %v449_v31  ;;  %v584_v38 = vmax.f32 %v558_v32, 0.0  ;;  %v760_v17 = vpop.permute.xlu0 %759 }
 0x20b   :  { %v979_v18 = vpop.f32.mrf.mxu1 }
 0x20c   :  { %v568_v25 = vadd.f32 %v979_v18, %v464_v19  ;;  %v583_v41 = vmax.f32 %v553_v34, 0.0  ;;  %v765_v19 = vrot.slane %v760_v17, %v764_v15 }
 0x20d   :  { %v562_v20 = vpop.f32.mrf.mxu1 }
 0x20e   :  { %v563_v29 = vadd.f32 %v562_v20, %v459_v21  ;;  %v586_v33 = vmax.f32 %v568_v25, 0.0 }
 0x20f   :  { %v982_v22 = vpop.f32.mrf.mxu1 }
 0x210   :  { %v578_v23 = vadd.f32 %v982_v22, %v474_v14  ;;  %v585_v35 = vmax.f32 %v563_v29, 0.0 }
 0x211   :  { %v572_v24 = vpop.f32.mrf.mxu1 }
 0x212   :  { %v588_v26 = vmax.f32 %v578_v23, 0.0  ;;  %v573_v27 = vadd.f32 %v572_v24, %v469_v16 }
 0x214   :  { %v587_v30 = vmax.f32 %v573_v27, 0.0  ;;  %983 = vmatprep.subr.mxu1 %v588_v26 }
 0x215   :  { %984 = vmatpush3.msra.mxu1 %v588_v26 }
 0x216   :  { %985 = vmatprep.subr.mxu1 %v587_v30 }
 0x217   :  { %986 = vmatpush3.msra.mxu1 %v587_v30 }
 0x218   :  { %987 = vmatprep.subr.mxu1 %v586_v33 }
 0x219   :  { %988 = vmatpush3.msra.mxu1 %v586_v33 }
 0x21a   :  { %989 = vmatprep.subr.mxu1 %v585_v35 }
 0x21b   :  { %990 = vmatpush3.msra.mxu1 %v585_v35 }
 0x21c   :  { %991 = vmatprep.subr.mxu1 %v584_v38 }
 0x21d   :  { %992 = vmatpush3.msra.mxu1 %v584_v38 }
 0x21e   :  { %993 = vmatprep.subr.mxu1 %v583_v41 }
 0x21f   :  { %994 = vmatpush3.msra.mxu1 %v583_v41 }
 0x220   :  { %995 = vmatprep.subr.mxu1 %v582_v42 }
 0x221   :  { %996 = vmatpush3.msra.mxu1 %v582_v42 }
 0x222   :  { %997 = vmatprep.subr.mxu1 %v581_v43 }
 0x223   :  { %998 = vmatpush3.msra.mxu1 %v581_v43 }
 0x224   :  { %1000 = vmatmul.mubr.msk.f32.vlgmr.msra.gmra.mxu1 %vm617_vm1, %v590_v44 }
 0x225   :  { %1002 = vmatprep.mubr.msk.f32.mxu1 %vm617_vm1, %v591_v45 }
 0x228   :  { %1003 = vmatmul.mubr.msk.f32.gmra.mxu1 %vm617_vm1, %v592_v46 }
 0x2e4   :  { %v1001_v51 = vpop.f32.mrf.mxu1 }
 0x2e5   :  { %v702_v52 = vadd.f32 %v1001_v51, %v605_v48 }
 0x2e6   :  { %v696_v53 = vpop.f32.mrf.mxu1 }
 0x2e7   :  { %v697_v54 = vadd.f32 %v696_v53, %v600_v47  ;;  %v716_v57 = vmax.f32 %v702_v52, 0.0 }
 0x2e8   :  { %v1004_v56 = vpop.f32.mrf.mxu1 }
 0x2e9   :  { %v715_v58 = vmax.f32 %v697_v54, 0.0  ;;  %v712_v59 = vadd.f32 %v1004_v56, %v615_v50  ;;  %v744_v0 = vmul.f32 %v731_v60, %v716_v57 }
 0x2ea   :  { %v706_v61 = vpop.f32.mrf.mxu1 }
 0x2eb   :  { %v743_v62 = vmul.f32 %v726_v55, %v715_v58  ;;  %v707_v63 = vadd.f32 %v706_v61, %v610_v49  ;;  %v718_v1 = vmax.f32 %v712_v59, 0.0 }
 0x2ed   :  { %v717_v2 = vmax.f32 %v707_v63, 0.0  ;;  %v747_v6 = vadd.f32 %v744_v0, %v743_v62  ;;  %v746_v7 = vmul.f32 %v741_v5, %v718_v1 }
 0x2ef   :  { %v745_v4 = vmul.f32 %v736_v3, %v717_v2 }
 0x2f1   :  { %v748_v8 = vadd.f32 %v747_v6, %v745_v4 }
 0x2f3   :  { %v749_v10 = vadd.f32 %v748_v8, %v746_v7 }
 0x2f5   :  { %v750_v11 = vrot.slane %v749_v10, 4 }
 0x2f7   :  { %v751_v13 = vadd.f32 %v750_v11, %v749_v10 }
 0x2f9   :  { %v752_v14 = vrot.slane %v751_v13, 2 }
 0x2fb   :  { %v753_v16 = vadd.f32 %v752_v14, %v751_v13 }
 0x2fd   :  { %v754_v18 = vrot.slane %v753_v16, 1 }
 0x2ff   :  { %v755_v20 = vadd.f32 %v754_v18, %v753_v16 }
 0x301   :  { %v766_v21 = vadd.f32 %v765_v19, %v755_v20 }
 0x303   :  { %v814_v22 = vmul.f32 -1.442695, %v766_v21 }
 0x305   :  { %1008 = vpow2.f32 %v814_v22 }
 0x312   :  { %v1009_v23 = vpop.eup %1008 }
 0x313   :  { %v770_v24 = vadd.f32 1.0, %v1009_v23 }
 0x315   :  { %1010 = vrcp.f32 %v770_v24 }
 0x322   :  { %v1011_v25 = vpop.eup %1010 }
 0x323   :  { %773 = vst [vmem:[%s1370_s9] sm:$0x1] %v1011_v25 }

</bundles_post_ra>
